<compile_context>
chip_gen: v6e
topology: v6e:2x2x1
jax: 0.10.0
libtpu: 0.0.40
codegen_flags: <defaults>
</compile_context>

<pallas_src>
import functools

import jax
import jax.numpy as jnp
from jax.experimental import pallas as pl
from jax.experimental.pallas import tpu as pltpu


def _round_up(v, m):
    return (v + m - 1) // m * m


def _vmem_cap_bytes():
    """Per-core VMEM capacity minus ~4 MiB headroom (generation aware)."""
    try:
        cap = int(pltpu.get_tpu_info().vmem_capacity_bytes)
    except Exception:
        cap = 64 * 1024 * 1024          # assume the smallest (v7x) if unknown
    return max(cap - (4 << 20), 16 << 20)


def _spec(shape, index_map, buffer_count=None):
    """BlockSpec with an optional multi-buffering hint; graceful fallback."""
    if buffer_count is not None and hasattr(pl, "Buffered"):
        try:
            return pl.BlockSpec(shape, index_map,
                                pipeline_mode=pl.Buffered(buffer_count))
        except TypeError:
            pass
    return pl.BlockSpec(shape, index_map)


def _sgc_fused_kernel(x_ref, w_ref, b_ref, g_ref, o_ref, h_ref, acc_ref,
                      *, k, t, n_pad):
    r = pl.program_id(0)      # propagation round: round r produces h_{r+1}
    i = pl.program_id(1)      # output row tile
    kk = pl.program_id(2)     # reduction tile over source rows (innermost)
    n_kk = pl.num_programs(2)

    # f32 accumulator for this (round, row-tile) reduction.
    @pl.when(kk == 0)
    def _init():
        acc_ref[...] = jnp.zeros_like(acc_ref)

    # Fold Linear + bias + ReLU into the first round: while i == 0 sweeps the
    # reduction tiles, compute h0 tile `kk` on demand and park it in ping-pong
    # slot 0.  The grid iterates i outer / kk inner, so every h0 tile exists
    # before any i > 0 reads it, and no grid plane is wasted on the linear.
    @pl.when(jnp.logical_and(r == 0, i == 0))
    def _linear_tile():
        h0 = jax.lax.dot_general(
            x_ref[...], w_ref[...],
            dimension_numbers=(((1,), (1,)), ((), ())),   # contract in_dim
            preferred_element_type=jnp.float32)
        h0 = jnp.maximum(h0 + b_ref[...], 0.0)
        row = pl.multiple_of(kk * t, t)
        h_ref[pl.ds(row, t), :] = h0.astype(h_ref.dtype)

    # h_{r+1}[i-tile] += g[i-tile, kk-tile] @ h_r[kk-tile]
    src_row = pl.multiple_of((r % 2) * n_pad + kk * t, t)
    acc_ref[...] += jnp.dot(g_ref[...], h_ref[pl.ds(src_row, t), :],
                            preferred_element_type=jnp.float32)

    @pl.when(kk == n_kk - 1)
    def _finalize():
        @pl.when(r == k - 1)
        def _emit():                      # final round: straight to HBM output
            o_ref[...] = acc_ref[...].astype(o_ref.dtype)

        @pl.when(r < k - 1)
        def _store():                     # intermediate round: to the other slot
            dst_row = pl.multiple_of(((r + 1) % 2) * n_pad + i * t, t)
            h_ref[pl.ds(dst_row, t), :] = acc_ref[...].astype(h_ref.dtype)


def _sgc_linear_kernel(x_ref, w_ref, b_ref, o_ref):
    h0 = jax.lax.dot_general(
        x_ref[...], w_ref[...],
        dimension_numbers=(((1,), (1,)), ((), ())),
        preferred_element_type=jnp.float32)
    o_ref[...] = jnp.maximum(h0 + b_ref[...], 0.0).astype(o_ref.dtype)


def sgc_forward(x, g, weight, bias, k, *, use_bf16=False):
    """Dense SGC forward.

    x: [N, in_dim], g: [N, N], weight: [emb, in_dim] (PyTorch layout),
    bias: [emb].  Returns [N, emb].
    """
    n, in_dim = x.shape
    emb = weight.shape[0]

    in_pad = _round_up(in_dim, 128)
    emb_pad = _round_up(emb, 128)
    n_pad = _round_up(n, 128)

    # Biggest MXU tile that divides the padded node count: 512 -> 256 -> 128.
    if n_pad % 512 == 0:
        t = 512
    elif n_pad % 256 == 0:
        t = 256
    else:
        t = 128
    n_i = n_pad // t

    g_dtype = jnp.bfloat16 if use_bf16 else g.dtype
    h_dtype = jnp.bfloat16 if use_bf16 else jnp.float32
    g_item = 2 if use_bf16 else 4
    h_item = 2 if use_bf16 else 4

    # Zero padding keeps the padded problem exact (see header comment).
    xp = jnp.zeros((n_pad, in_pad), x.dtype).at[:n, :in_dim].set(x)
    gp = jnp.zeros((n_pad, n_pad), g_dtype).at[:n, :n].set(g.astype(g_dtype))
    wp = jnp.zeros((emb_pad, in_pad), weight.dtype).at[:emb, :in_dim].set(weight)
    bp = jnp.zeros((1, emb_pad), bias.dtype).at[0, :emb].set(bias)

    vmem_cap = _vmem_cap_bytes()

    if k == 0:
        # Degenerate config: just the tiled Linear + ReLU.
        def run0(hints):
            bc = 1 if hints else None
            need = 4 * (2 * t * in_pad + emb_pad * in_pad + emb_pad
                        + 2 * t * emb_pad)
            limit = int(min(vmem_cap,
                            max(32 << 20, int(need * 1.25) + (2 << 20))))
            return pl.pallas_call(
                _sgc_linear_kernel,
                out_shape=jax.ShapeDtypeStruct((n_pad, emb_pad), x.dtype),
                grid_spec=pltpu.PrefetchScalarGridSpec(
                    num_scalar_prefetch=0,
                    grid=(n_i,),
                    in_specs=[
                        _spec((t, in_pad), lambda i: (i, 0)),
                        _spec((emb_pad, in_pad), lambda i: (0, 0), bc),
                        _spec((1, emb_pad), lambda i: (0, 0), bc),
                    ],
                    out_specs=pl.BlockSpec((t, emb_pad), lambda i: (i, 0)),
                ),
                compiler_params=pltpu.CompilerParams(
                    dimension_semantics=("parallel",),
                    vmem_limit_bytes=limit,
                ),
            )(xp, wp, bp)

        try:
            out = jax.block_until_ready(run0(True))
        except Exception:
            out = run0(False)
        return out[:n, :emb]

    kernel = functools.partial(_sgc_fused_kernel, k=k, t=t, n_pad=n_pad)

    def run(hints):
        w_bufs = 1 if hints else 2
        g_bufs = 3 if hints else 2
        need = (
            2 * t * in_pad * 4               # x tiles (double buffered)
            + w_bufs * emb_pad * in_pad * 4  # W (fetched once)
            + w_bufs * emb_pad * 4           # bias
            + g_bufs * t * t * g_item        # streamed g tiles
            + 2 * t * emb_pad * 4            # output tiles
            + 2 * n_pad * emb_pad * h_item   # h ping-pong scratch
            + t * emb_pad * 4                # f32 accumulator
        )
        limit = int(min(vmem_cap, max(32 << 20, int(need * 1.25) + (2 << 20))))
        return pl.pallas_call(
            kernel,
            out_shape=jax.ShapeDtypeStruct((n_pad, emb_pad), x.dtype),
            grid_spec=pltpu.PrefetchScalarGridSpec(
                num_scalar_prefetch=0,
                grid=(k, n_i, n_i),
                in_specs=[
                    # x: streamed by kk only while the folded linear runs
                    # (r == 0, i == 0); pinned otherwise -> no redundant DMA.
                    _spec((t, in_pad),
                          lambda r, i, kk: (
                              jnp.where(jnp.logical_and(r == 0, i == 0), kk, 0),
                              0)),
                    # W (PyTorch [emb, in_dim] layout), constant index ->
                    # fetched once; Buffered(1) avoids a wasted 2nd VMEM copy.
                    _spec((emb_pad, in_pad), lambda r, i, kk: (0, 0),
                          1 if hints else None),
                    _spec((1, emb_pad), lambda r, i, kk: (0, 0),
                          1 if hints else None),
                    # g: the unavoidable k*N^2 stream; 3-deep buffering keeps
                    # the DMA queue full across accumulator init/finalize.
                    _spec((t, t), lambda r, i, kk: (i, kk),
                          3 if hints else None),
                ],
                # Output index only moves during the final round, so no
                # intermediate / garbage block is ever written back to HBM.
                out_specs=pl.BlockSpec(
                    (t, emb_pad),
                    lambda r, i, kk: (jnp.where(r == k - 1, i, 0), 0)),
                scratch_shapes=[
                    pltpu.VMEM((2 * n_pad, emb_pad), h_dtype),  # h ping-pong
                    pltpu.VMEM((t, emb_pad), jnp.float32),      # accumulator
                ],
            ),
            compiler_params=pltpu.CompilerParams(
                # Row tiles are NOT "parallel": the h ping-pong scratch carries
                # state across rounds/row tiles (per-core VMEM would break it).
                dimension_semantics=("arbitrary", "arbitrary", "arbitrary"),
                vmem_limit_bytes=limit,
            ),
        )(xp, wp, bp, gp)

    try:
        out = jax.block_until_ready(run(True))
    except Exception:
        out = run(False)
    return out[:n, :emb]


def sgc_reference(x, g, weight, bias, k):
    h = jnp.maximum(x @ weight.T + bias, 0.0)
    for _ in range(k):
        h = g @ h
    return h


if __name__ == "__main__":
    # Small synthetic problem consistent with the module's forward.
    N, IN_DIM, EMB_DIM, K = 16, 32, 32, 2

    key = jax.random.PRNGKey(0)
    kx, kg, kw, kb = jax.random.split(key, 4)

    x = jax.random.normal(kx, (N, IN_DIM), dtype=jnp.float32)
    # Row-normalized dense "adjacency" so propagation stays well-scaled.
    g_raw = jax.random.uniform(kg, (N, N), dtype=jnp.float32)
    g = g_raw / jnp.sum(g_raw, axis=1, keepdims=True)

    # Deterministic nn.Linear(in_dim, emb_dim) params (uniform +/- 1/sqrt(in_dim)).
    bound = 1.0 / (IN_DIM ** 0.5)
    weight = jax.random.uniform(kw, (EMB_DIM, IN_DIM), dtype=jnp.float32,
                                minval=-bound, maxval=bound)
    bias = jax.random.uniform(kb, (EMB_DIM,), dtype=jnp.float32,
                              minval=-bound, maxval=bound)

    ref = sgc_reference(x, g, weight, bias, K)

    out = jax.block_until_ready(sgc_forward(x, g, weight, bias, K))
    assert out.shape == (N, EMB_DIM)
    assert jnp.allclose(out, ref, atol=1e-4, rtol=1e-4), "f32 mismatch vs reference"

    # Optional reduced-precision path (bf16 g / h, f32 accumulation).
    out_bf16 = jax.block_until_ready(
        sgc_forward(x, g, weight, bias, K, use_bf16=True))
    assert jnp.allclose(out_bf16, ref, atol=3e-2, rtol=3e-2), "bf16 mismatch vs reference"

    print("KERNEL_OK")
</pallas_src>

<mosaic_0001>
module attributes {stable_mosaic.version = 11 : i64} {
  func.func @_sgc_fused_kernel(%arg0: i32, %arg1: i32, %arg2: i32, %arg3: memref<128x128xf32, #tpu.memory_space<vmem>>, %arg4: memref<128x128xf32, #tpu.memory_space<vmem>>, %arg5: memref<1x128xf32, #tpu.memory_space<vmem>>, %arg6: memref<128x128xf32, #tpu.memory_space<vmem>>, %arg7: memref<128x128xf32, #tpu.memory_space<vmem>>, %arg8: memref<256x128xf32, #tpu.memory_space<vmem>>, %arg9: memref<128x128xf32, #tpu.memory_space<vmem>>) attributes {dimension_semantics = [#tpu.dimension_semantics<arbitrary>, #tpu.dimension_semantics<arbitrary>, #tpu.dimension_semantics<arbitrary>], iteration_bounds = array<i64: 2, 1, 1>, scalar_prefetch = 0 : i64, scratch_operands = 2 : i64, tpu.core_type = #tpu.core_type<tc>, window_params = [{transform_indices = @transform_0, window_bounds = array<i64: 128, 128>}, {pipeline_mode = #tpu.pipeline_mode<synchronous>, transform_indices = @transform_1, window_bounds = array<i64: 128, 128>}, {pipeline_mode = #tpu.pipeline_mode<synchronous>, transform_indices = @transform_2, window_bounds = array<i64: 1, 128>}, {transform_indices = @transform_3, window_bounds = array<i64: 128, 128>}, {transform_indices = @transform_4, window_bounds = array<i64: 128, 128>}]} {
    %c0_i32 = arith.constant 0 : i32
    %0 = arith.cmpi eq, %arg2, %c0_i32 : i32
    %1 = arith.extui %0 : i1 to i32
    %c0_i32_0 = arith.constant 0 : i32
    %2 = arith.cmpi ne, %1, %c0_i32_0 : i32
    scf.if %2 {
      %cst_17 = arith.constant 0.000000e+00 : f32
      %32 = vector.broadcast %cst_17 : f32 to vector<128x128xf32>
      %c0_18 = arith.constant 0 : index
      %c0_19 = arith.constant 0 : index
      %33 = vector.load %arg9[%c0_18, %c0_19] : memref<128x128xf32, #tpu.memory_space<vmem>>, vector<128x128xf32>
      tpu.vector_store %arg9[%c0_18, %c0_19], %32 {strides = array<i32>} : memref<128x128xf32, #tpu.memory_space<vmem>>, vector<128x128xf32>,
    } else {
    }
    %c0_i32_1 = arith.constant 0 : i32
    %3 = arith.cmpi eq, %arg0, %c0_i32_1 : i32
    %c0_i32_2 = arith.constant 0 : i32
    %4 = arith.cmpi eq, %arg1, %c0_i32_2 : i32
    %5 = arith.andi %3, %4 : i1
    %6 = arith.extui %5 : i1 to i32
    %c0_i32_3 = arith.constant 0 : i32
    %7 = arith.cmpi ne, %6, %c0_i32_3 : i32
    scf.if %7 {
      %c0_17 = arith.constant 0 : index
      %c0_18 = arith.constant 0 : index
      %32 = vector.load %arg3[%c0_17, %c0_18] : memref<128x128xf32, #tpu.memory_space<vmem>>, vector<128x128xf32>
      %c0_19 = arith.constant 0 : index
      %c0_20 = arith.constant 0 : index
      %33 = vector.load %arg4[%c0_19, %c0_20] : memref<128x128xf32, #tpu.memory_space<vmem>>, vector<128x128xf32>
      %cst_21 = arith.constant dense<0.000000e+00> : vector<128x128xf32>
      %34 = tpu.matmul %32, %33, %cst_21 {dimension_numbers = #tpu.dot_dimension_numbers<[1], [1], [0], [0], [0, 0, 1, 0], [], []>} : vector<128x128xf32>, vector<128x128xf32>, vector<128x128xf32> -> vector<128x128xf32>
      %c0_22 = arith.constant 0 : index
      %c0_23 = arith.constant 0 : index
      %35 = vector.load %arg5[%c0_22, %c0_23] : memref<1x128xf32, #tpu.memory_space<vmem>>, vector<1x128xf32>
      %36 = vector.broadcast %35 : vector<1x128xf32> to vector<128x128xf32>
      %37 = arith.addf %34, %36 : vector<128x128xf32>
      %cst_24 = arith.constant 0.000000e+00 : f32
      %38 = vector.broadcast %cst_24 : f32 to vector<128x128xf32>
      %39 = arith.maximumf %37, %38 : vector<128x128xf32>
      %c128_i32_25 = arith.constant 128 : i32
      %40 = arith.muli %arg2, %c128_i32_25 : i32
      %41 = tpu.assume_multiple %40, 128 : i32
      %42 = arith.index_cast %41 : i32 to index
      %c0_26 = arith.constant 0 : index
      %43 = vector.load %arg8[%42, %c0_26] : memref<256x128xf32, #tpu.memory_space<vmem>>, vector<128x128xf32>
      tpu.vector_store %arg8[%42, %c0_26], %39 {strides = array<i32>} : memref<256x128xf32, #tpu.memory_space<vmem>>, vector<128x128xf32>,
    } else {
    }
    %c2_i32 = arith.constant 2 : i32
    %c0_i32_4 = arith.constant 0 : i32
    %8 = arith.cmpi eq, %c2_i32, %c0_i32_4 : i32
    %c1_i32 = arith.constant 1 : i32
    %9 = arith.select %8, %c1_i32, %c2_i32 : i32
    %10 = arith.remsi %arg0, %9 : i32
    %c0_i32_5 = arith.constant 0 : i32
    %11 = arith.cmpi ne, %10, %c0_i32_5 : i32
    %c0_i32_6 = arith.constant 0 : i32
    %12 = arith.cmpi slt, %10, %c0_i32_6 : i32
    %c0_i32_7 = arith.constant 0 : i32
    %13 = arith.cmpi slt, %9, %c0_i32_7 : i32
    %14 = arith.xori %12, %13 : i1
    %15 = arith.andi %14, %11 : i1
    %16 = arith.addi %10, %9 : i32
    %17 = arith.select %15, %16, %10 : i32
    %c128_i32 = arith.constant 128 : i32
    %18 = arith.muli %17, %c128_i32 : i32
    %c128_i32_8 = arith.constant 128 : i32
    %19 = arith.muli %arg2, %c128_i32_8 : i32
    %20 = arith.addi %18, %19 : i32
    %21 = tpu.assume_multiple %20, 128 : i32
    %c0 = arith.constant 0 : index
    %c0_9 = arith.constant 0 : index
    %22 = vector.load %arg9[%c0, %c0_9] : memref<128x128xf32, #tpu.memory_space<vmem>>, vector<128x128xf32>
    %c0_10 = arith.constant 0 : index
    %c0_11 = arith.constant 0 : index
    %23 = vector.load %arg6[%c0_10, %c0_11] : memref<128x128xf32, #tpu.memory_space<vmem>>, vector<128x128xf32>
    %24 = arith.index_cast %21 : i32 to index
    %c0_12 = arith.constant 0 : index
    %25 = vector.load %arg8[%24, %c0_12] : memref<256x128xf32, #tpu.memory_space<vmem>>, vector<128x128xf32>
    %cst = arith.constant dense<0.000000e+00> : vector<128x128xf32>
    %26 = tpu.matmul %23, %25, %cst {dimension_numbers = #tpu.dot_dimension_numbers<[1], [0], [0], [1], [0, 0, 1, 1], [], []>} : vector<128x128xf32>, vector<128x128xf32>, vector<128x128xf32> -> vector<128x128xf32>
    %27 = arith.addf %22, %26 : vector<128x128xf32>
    %c0_13 = arith.constant 0 : index
    %c0_14 = arith.constant 0 : index
    %28 = vector.load %arg9[%c0_13, %c0_14] : memref<128x128xf32, #tpu.memory_space<vmem>>, vector<128x128xf32>
    tpu.vector_store %arg9[%c0_13, %c0_14], %27 {strides = array<i32>} : memref<128x128xf32, #tpu.memory_space<vmem>>, vector<128x128xf32>,
    %c0_i32_15 = arith.constant 0 : i32
    %29 = arith.cmpi eq, %arg2, %c0_i32_15 : i32
    %30 = arith.extui %29 : i1 to i32
    %c0_i32_16 = arith.constant 0 : i32
    %31 = arith.cmpi ne, %30, %c0_i32_16 : i32
    scf.if %31 {
      %c1_i32_17 = arith.constant 1 : i32
      %32 = arith.cmpi eq, %arg0, %c1_i32_17 : i32
      %33 = arith.extui %32 : i1 to i32
      %c0_i32_18 = arith.constant 0 : i32
      %34 = arith.cmpi ne, %33, %c0_i32_18 : i32
      scf.if %34 {
        %c0_21 = arith.constant 0 : index
        %c0_22 = arith.constant 0 : index
        %38 = vector.load %arg9[%c0_21, %c0_22] : memref<128x128xf32, #tpu.memory_space<vmem>>, vector<128x128xf32>
        %c0_23 = arith.constant 0 : index
        %c0_24 = arith.constant 0 : index
        %39 = vector.load %arg7[%c0_23, %c0_24] : memref<128x128xf32, #tpu.memory_space<vmem>>, vector<128x128xf32>
        tpu.vector_store %arg7[%c0_23, %c0_24], %38 {strides = array<i32>} : memref<128x128xf32, #tpu.memory_space<vmem>>, vector<128x128xf32>,
      } else {
      }
      %c1_i32_19 = arith.constant 1 : i32
      %35 = arith.cmpi slt, %arg0, %c1_i32_19 : i32
      %36 = arith.extui %35 : i1 to i32
      %c0_i32_20 = arith.constant 0 : i32
      %37 = arith.cmpi ne, %36, %c0_i32_20 : i32
      scf.if %37 {
        %c1_i32_21 = arith.constant 1 : i32
        %38 = arith.addi %arg0, %c1_i32_21 : i32
        %c2_i32_22 = arith.constant 2 : i32
        %c0_i32_23 = arith.constant 0 : i32
        %39 = arith.cmpi eq, %c2_i32_22, %c0_i32_23 : i32
        %c1_i32_24 = arith.constant 1 : i32
        %40 = arith.select %39, %c1_i32_24, %c2_i32_22 : i32
        %41 = arith.remsi %38, %40 : i32
        %c0_i32_25 = arith.constant 0 : i32
        %42 = arith.cmpi ne, %41, %c0_i32_25 : i32
        %c0_i32_26 = arith.constant 0 : i32
        %43 = arith.cmpi slt, %41, %c0_i32_26 : i32
        %c0_i32_27 = arith.constant 0 : i32
        %44 = arith.cmpi slt, %40, %c0_i32_27 : i32
        %45 = arith.xori %43, %44 : i1
        %46 = arith.andi %45, %42 : i1
        %47 = arith.addi %41, %40 : i32
        %48 = arith.select %46, %47, %41 : i32
        %c128_i32_28 = arith.constant 128 : i32
        %49 = arith.muli %48, %c128_i32_28 : i32
        %c128_i32_29 = arith.constant 128 : i32
        %50 = arith.muli %arg1, %c128_i32_29 : i32
        %51 = arith.addi %49, %50 : i32
        %52 = tpu.assume_multiple %51, 128 : i32
        %c0_30 = arith.constant 0 : index
        %c0_31 = arith.constant 0 : index
        %53 = vector.load %arg9[%c0_30, %c0_31] : memref<128x128xf32, #tpu.memory_space<vmem>>, vector<128x128xf32>
        %54 = arith.index_cast %52 : i32 to index
        %c0_32 = arith.constant 0 : index
        %55 = vector.load %arg8[%54, %c0_32] : memref<256x128xf32, #tpu.memory_space<vmem>>, vector<128x128xf32>
        tpu.vector_store %arg8[%54, %c0_32], %53 {strides = array<i32>} : memref<256x128xf32, #tpu.memory_space<vmem>>, vector<128x128xf32>,
      } else {
      }
    } else {
    }
    return
  }
  func.func @transform_0(%arg0: i32, %arg1: i32, %arg2: i32) -> (i32, i32) {
    %c0_i32 = arith.constant 0 : i32
    %0 = arith.cmpi eq, %arg0, %c0_i32 : i32
    %c0_i32_0 = arith.constant 0 : i32
    %1 = arith.cmpi eq, %arg1, %c0_i32_0 : i32
    %2 = arith.andi %0, %1 : i1
    %c0_i32_1 = arith.constant 0 : i32
    %3 = arith.select %2, %arg2, %c0_i32_1 : i32
    %c0_i32_2 = arith.constant 0 : i32
    %c0_i32_3 = arith.constant 0 : i32
    return %3, %c0_i32_2 : i32, i32
  }
  func.func @transform_1(%arg0: i32, %arg1: i32, %arg2: i32) -> (i32, i32) {
    %c0_i32 = arith.constant 0 : i32
    %c0_i32_0 = arith.constant 0 : i32
    %c0_i32_1 = arith.constant 0 : i32
    return %c0_i32, %c0_i32_0 : i32, i32
  }
  func.func @transform_2(%arg0: i32, %arg1: i32, %arg2: i32) -> (i32, i32) {
    %c0_i32 = arith.constant 0 : i32
    %c0_i32_0 = arith.constant 0 : i32
    %c0_i32_1 = arith.constant 0 : i32
    return %c0_i32, %c0_i32_0 : i32, i32
  }
  func.func @transform_3(%arg0: i32, %arg1: i32, %arg2: i32) -> (i32, i32) {
    %c0_i32 = arith.constant 0 : i32
    return %arg1, %arg2 : i32, i32
  }
  func.func @transform_4(%arg0: i32, %arg1: i32, %arg2: i32) -> (i32, i32) {
    %c1_i32 = arith.constant 1 : i32
    %0 = arith.cmpi eq, %arg0, %c1_i32 : i32
    %c0_i32 = arith.constant 0 : i32
    %1 = arith.select %0, %arg1, %c0_i32 : i32
    %c0_i32_0 = arith.constant 0 : i32
    %c0_i32_1 = arith.constant 0 : i32
    return %1, %c0_i32_0 : i32, i32
  }
}

</mosaic_0001>

<bundles_post_ra>
// kernel: tpu_custom_call.1
= control target key start
LH: loop header
LB: loop body
LE: loop exit
PB: predicated region body
PF: predicated region fallthrough
CT: control target
= control target key end

     0   :  { %9 = vsyncpa [#allocation5], 0  ;;  %s1683_s0 = inlined_call_operand.hbm [shape: f32[128,128], index: 0, kind: input, shape index: {}]   ;;  %s1684_s1 = inlined_call_operand.hbm [shape: f32[128,128], index: 1, kind: input, shape index: {}]   ;;  %s1685_s2 = inlined_call_operand.vmem [shape: f32[1,128], index: 2, kind: input, shape index: {}]   ;;  %s1686_s3 = inlined_call_operand.hbm [shape: f32[128,128], index: 3, kind: input, shape index: {}]   ;;  %s1687_s4 = inlined_call_operand.hbm [shape: f32[128,128], index: 4, kind: output, shape index: {}]  }
   0x1   :  { %11 = vsyncpa [#allocation5 + $0x1], 0 }
   0x2   :  { %12 = vsyncpa [#allocation8], 0 }
   0x3   :  { %13 = vsyncpa [#allocation6], 0 }
   0x4   :  { %15 = vsyncpa [#allocation6 + $0x1], 0  ;;  %s1534_s15 = smov 0   ;;  %s1536_s16 = smov 0  }
   0x5   :  { %s1538_s17 = smov 0  }
   0x6 LB: > { %s1014_s18 = sadd.s32 4294967295, %s1498_s17   ;;  %s1015_s19 = sadd.s32 4294967294, %s1498_s17   ;;  %s1498_s17 = sphi %s1538_s17, %s21_s17   ;;  %s1494_s16 = sphi %s1536_s16, %s1695_s16   ;;  %s1490_s15 = sphi %s1534_s15, %s1694_s15  }
   0x7   : > { %s40_s20 = sadd.s32 1, %s1494_s16  ;;  %p1018_p0 = scmp.ge.s32.totalorder %s1498_s17, 1 }
   0x8   : > { %p42_p1 = scmp.ge.s32.totalorder %s40_s20, 2  ;;  %p181_p2 = scmp.lt.s32.totalorder %s1498_s17, 3 }
   0x9   : > { %p1556_p3 = scmp.eq.s32.totalorder %s1014_s18, 0  ;;  %s1500_s23 = smov [#allocation7]  }
   0xa   : > { %s1697_s20 = smov (%p42_p1, %s40_s20), 0  ;;  %p1562_p4 = pnand %p1018_p0, %p181_p2 }
   0xb   : > { %s193_s24 = sshll.u32 %s1500_s23, 4  ;;  %p1321_p8 = scmp.lt.s32.totalorder %s1498_s17, 2  ;;  %s194_s24 = int_to_ptr.vmem [resolvable:$true] %s193_s24 }
   0xc   : > { %p1304_p5 = pneg %p1562_p4  ;;  %s1501_s26 = smov [#allocation9]  }
   0xd   : > { %s213_s27 = sshll.u32 %s1501_s26, 4  ;;  %s1373_s28 = scalar_lea.vmem %s194_s24, 2048  ;;  %s214_s27 = int_to_ptr.vmem [resolvable:$true] %s213_s27 }
   0xe   : > { %p1571_p7 = pnand %p1556_p3, %p1304_p5  ;;  %p1374_p10 = scmp.ne.s32.totalorder %s194_s24, %s1373_s28 }
   0xf   : > { %p1381_p13 = scmp.lt.s32.totalorder %s194_s24, %s194_s24  ;;  %p1382_p0 = scmp.lt.s32.totalorder %s1373_s28, %s1373_s28 }
  0x10   : > { %p1364_p9 = pneg %p1571_p7 }
  0x11   : > { %p1383_p1 = por %p1382_p0, %p1381_p13 }
  0x12   : > { %p1376_p11 = pnand %p1374_p10, %p1364_p9 }
  0x14   : > { %p1377_p12 = pneg %p1376_p11 }
  0x16   : > { %p1384_p2 = pnand %p1383_p1, %p1377_p12 }
  0x18   : > { %1387 = shalt.err (!%p1384_p2)
}
  0x19   : > { %s1502_s29 = smov 128   ;;  %s1503_s30 = smov 8  }
  0x1a   : > { %1307 = dma.hbm_to_vmem [thread:$0]  (!%p1571_p7), %s1684_s1, 2048, %s194_s24, [#allocation8], %s1502_s29, %s1502_s29, %s1503_s30  }
  0x1b   : > { %p1322_p5 = scmp.eq.s32.totalorder %s1498_s17, 0  ;;  %s1399_s7 = scalar_lea.vmem %s214_s27, 2048 }
  0x1c   : > { %p1400_p10 = scmp.ne.s32.totalorder %s214_s27, %s1399_s7  ;;  %p1407_p13 = scmp.lt.s32.totalorder %s214_s27, %s214_s27 }
  0x1d   : > { %p1408_p0 = scmp.lt.s32.totalorder %s1399_s7, %s1399_s7 }
  0x1e   : > { %p1402_p11 = pnand %p1400_p10, %p1364_p9 }
  0x1f   : > { %p1409_p1 = por %p1408_p0, %p1407_p13 }
  0x20   : > { %p1403_p12 = pneg %p1402_p11 }
  0x22   : > { %p1410_p2 = pnand %p1409_p1, %p1403_p12 }
  0x24   : > { %1413 = shalt.err (!%p1410_p2)
}
  0x25   : > { %1310 = dma.hbm_to_vmem [thread:$0]  (!%p1571_p7), %s1686_s3, 2048, %s214_s27, [#allocation8], %s1502_s29, %s1502_s29, %s1503_s30  }
  0x26   : > { %p1603_p6 = pnand %p1322_p5, %p1321_p8  ;;  %s1504_s11 = smov [#allocation4]  }
  0x27   : > { %s243_s12 = sshll.u32 %s1504_s11, 4  ;;  %s244_s12 = int_to_ptr.vmem [resolvable:$true] %s243_s12 }
  0x28   : > { %p1416_p9 = pneg %p1603_p6  ;;  %s1425_s13 = scalar_lea.vmem %s244_s12, 2048 }
  0x29   : > { %p1426_p10 = scmp.ne.s32.totalorder %s244_s12, %s1425_s13  ;;  %s1432_s14 = scalar_lea.vmem %s244_s12, 4096 }
  0x2a   : > { %p1433_p13 = scmp.lt.s32.totalorder %s244_s12, %s244_s12  ;;  %p1434_p0 = scmp.lt.s32.totalorder %s1432_s14, %s1425_s13 }
  0x2b   : > { %p1428_p11 = pnand %p1426_p10, %p1416_p9 }
  0x2c   : > { %p1435_p1 = por %p1434_p0, %p1433_p13 }
  0x2d   : > { %p1429_p12 = pneg %p1428_p11 }
  0x2f   : > { %p1436_p7 = pnand %p1435_p1, %p1429_p12 }
  0x31   : > { %1439 = shalt.err (!%p1436_p7)
}
  0x32   : > { %1314 = dma.hbm_to_vmem [thread:$0]  (!%p1603_p6), %s1683_s0, 2048, %s244_s12, [#allocation5], %s1502_s29, %s1502_s29, %s1503_s30  }
  0x33   : > { %255 = sbr.rel (%p1562_p4) target bundleno = 634 (0x27a), region = 36 }
  0x38   : > { %1477 = dma.done.wait (%p1556_p3), [#allocation5], 2048  }
  0x39   : > { %1479 = vsyncadd (%p1556_p3), [#allocation5], 4294965248 }
  0x3a   : > { %1481 = dma.done.wait (%p1556_p3), [#allocation8], 4096  }
  0x3b   : > { %1483 = vsyncadd (%p1556_p3), [#allocation8], 4294963200  ;;  %p324_p8 = scmp.eq.s32.totalorder %s1490_s15, 0  ;;  %v1505_v0 = vmov 0.0  }
  0x3c   : > { %308 = vst [vmem:[#allocation3 + $0x30] sm:$0xff] %v1505_v0  ;;  %309 = vst [vmem:[#allocation3] sm:$0xff] %v1505_v0  ;;  %v361_v1 = vld [vmem:[#allocation7 + $0x78] sm:$0xff] (%p324_p8)  ;;  %v360_v2 = vld [vmem:[#allocation7 + $0x70] sm:$0xff] (%p324_p8) }
  0x3d   : > { %310 = vst [vmem:[#allocation3 + $0x58] sm:$0xff] %v1505_v0  ;;  %311 = vst [vmem:[#allocation3 + $0x18] sm:$0xff] %v1505_v0  ;;  %1112 = vmatprep.subr.mxu0 (%p324_p8), %v361_v1  ;;  %1224 = vmatprep.subr.mxu1 (%p324_p8), %v361_v1  ;;  %v359_v3 = vld [vmem:[#allocation7 + $0x68] sm:$0xff] (%p324_p8)  ;;  %v330_v4 = vld [vmem:[#allocation4] sm:$0xff] (%p324_p8) }
  0x3e   : > { %312 = vst [vmem:[#allocation3 + $0x50] sm:$0xff] %v1505_v0  ;;  %313 = vst [vmem:[#allocation3 + $0x68] sm:$0xff] %v1505_v0  ;;  %1113 = vmatpush3.xpose.msra.mxu0 (%p324_p8), %v361_v1  ;;  %1240 = vmatpush3.xpose.msra.mxu1 (%p324_p8), %v361_v1  ;;  %v338_v5 = vld [vmem:[#allocation4 + $0x40] sm:$0xff] (%p324_p8)  ;;  %v357_v7 = vld [vmem:[#allocation7 + $0x58] sm:$0xff] (%p324_p8) }
  0x3f   : > { %314 = vst [vmem:[#allocation3 + $0x8] sm:$0xff] %v1505_v0  ;;  %315 = vst [vmem:[#allocation3 + $0x48] sm:$0xff] %v1505_v0  ;;  %329 = sbr.rel (!%p324_p8) target bundleno = 337 (0x151), region = 56  ;;  %1114 = vmatprep.subr.mxu0 (%p324_p8), %v360_v2  ;;  %1225 = vmatprep.subr.mxu1 (%p324_p8), %v360_v2  ;;  %v358_v6 = vld [vmem:[#allocation7 + $0x60] sm:$0xff] (%p324_p8)  ;;  %v356_v8 = vld [vmem:[#allocation7 + $0x50] sm:$0xff] (%p324_p8) }
  0x40   : > { %316 = vst [vmem:[#allocation3 + $0x40] sm:$0xff] %v1505_v0  ;;  %317 = vst [vmem:[#allocation3 + $0x20] sm:$0xff] %v1505_v0  ;;  %1144 = vmatprep.mubr.f32.mxu0 (%p324_p8), %v330_v4  ;;  %1156 = vmatprep.mubr.f32.mxu1 (%p324_p8), %v338_v5  ;;  %v355_v9 = vld [vmem:[#allocation7 + $0x48] sm:$0xff] (%p324_p8)  ;;  %v354_v10 = vld [vmem:[#allocation7 + $0x40] sm:$0xff] (%p324_p8) }
  0x41   : > { %318 = vst [vmem:[#allocation3 + $0x10] sm:$0xff] %v1505_v0  ;;  %319 = vst [vmem:[#allocation3 + $0x38] sm:$0xff] %v1505_v0  ;;  %v353_v11 = vld [vmem:[#allocation7 + $0x38] sm:$0xff] (%p324_p8)  ;;  %v352_v12 = vld [vmem:[#allocation7 + $0x30] sm:$0xff] (%p324_p8) }
  0x42   : > { %320 = vst [vmem:[#allocation3 + $0x60] sm:$0xff] %v1505_v0  ;;  %321 = vst [vmem:[#allocation3 + $0x70] sm:$0xff] %v1505_v0  ;;  %1115 = vmatpush3.xpose.msra.mxu0 (%p324_p8), %v360_v2  ;;  %1241 = vmatpush3.xpose.msra.mxu1 (%p324_p8), %v360_v2  ;;  %v351_v13 = vld [vmem:[#allocation7 + $0x28] sm:$0xff] (%p324_p8)  ;;  %v350_v14 = vld [vmem:[#allocation7 + $0x20] sm:$0xff] (%p324_p8) }
  0x43   : > { %322 = vst [vmem:[#allocation3 + $0x78] sm:$0xff] %v1505_v0  ;;  %323 = vst [vmem:[#allocation3 + $0x28] sm:$0xff] %v1505_v0  ;;  %1116 = vmatprep.subr.mxu0 (%p324_p8), %v359_v3  ;;  %1226 = vmatprep.subr.mxu1 (%p324_p8), %v359_v3  ;;  %v349_v15 = vld [vmem:[#allocation7 + $0x18] sm:$0xff] (%p324_p8)  ;;  %v348_v16 = vld [vmem:[#allocation7 + $0x10] sm:$0xff] (%p324_p8) }
  0x44   : > { %v347_v17 = vld [vmem:[#allocation7 + $0x8] sm:$0xff]  ;;  %v346_v18 = vld [vmem:[#allocation7] sm:$0xff]  ;;  %v332_v21 = vld [vmem:[#allocation4 + $0x10] sm:$0xff] }
  0x45   : > { %v331_v19 = vld [vmem:[#allocation4 + $0x8] sm:$0xff]  ;;  %v340_v22 = vld [vmem:[#allocation4 + $0x50] sm:$0xff]  ;;  %v333_v23 = vld [vmem:[#allocation4 + $0x18] sm:$0xff] }
  0x46   : > { %1117 = vmatpush3.xpose.msra.mxu0 %v359_v3  ;;  %1242 = vmatpush3.xpose.msra.mxu1 %v359_v3  ;;  %v339_v20 = vld [vmem:[#allocation4 + $0x48] sm:$0xff]  ;;  %v341_v24 = vld [vmem:[#allocation4 + $0x58] sm:$0xff]  ;;  %v334_v25 = vld [vmem:[#allocation4 + $0x20] sm:$0xff] }
  0x47   : > { %1118 = vmatprep.subr.mxu0 %v358_v6  ;;  %1227 = vmatprep.subr.mxu1 %v358_v6  ;;  %v342_v26 = vld [vmem:[#allocation4 + $0x60] sm:$0xff]  ;;  %v335_v27 = vld [vmem:[#allocation4 + $0x28] sm:$0xff]  ;;  %v336_v29 = vld [vmem:[#allocation4 + $0x30] sm:$0xff] }
  0x48   : > { %v343_v28 = vld [vmem:[#allocation4 + $0x68] sm:$0xff]  ;;  %v344_v30 = vld [vmem:[#allocation4 + $0x70] sm:$0xff]  ;;  %v337_v31 = vld [vmem:[#allocation4 + $0x38] sm:$0xff] }
  0x49   : > { %v345_v32 = vld [vmem:[#allocation4 + $0x78] sm:$0xff]  ;;  %v1029_v33 = vld [vmem:[%s1685_s2] ss:$0 sm:$0xff] }
  0x4a   : > { %1119 = vmatpush3.xpose.msra.mxu0 %v358_v6  ;;  %1243 = vmatpush3.xpose.msra.mxu1 %v358_v6 }
  0x4b   : > { %1120 = vmatprep.subr.mxu0 %v357_v7  ;;  %1228 = vmatprep.subr.mxu1 %v357_v7 }
  0x4e   : > { %1121 = vmatpush3.xpose.msra.mxu0 %v357_v7  ;;  %1244 = vmatpush3.xpose.msra.mxu1 %v357_v7 }
  0x4f   : > { %1122 = vmatprep.subr.mxu0 %v356_v8  ;;  %1229 = vmatprep.subr.mxu1 %v356_v8 }
  0x52   : > { %1123 = vmatpush3.xpose.msra.mxu0 %v356_v8  ;;  %1245 = vmatpush3.xpose.msra.mxu1 %v356_v8 }
  0x53   : > { %1124 = vmatprep.subr.mxu0 %v355_v9  ;;  %1230 = vmatprep.subr.mxu1 %v355_v9 }
  0x56   : > { %1125 = vmatpush3.xpose.msra.mxu0 %v355_v9  ;;  %1246 = vmatpush3.xpose.msra.mxu1 %v355_v9 }
  0x57   : > { %1126 = vmatprep.subr.mxu0 %v354_v10  ;;  %1231 = vmatprep.subr.mxu1 %v354_v10 }
  0x5a   : > { %1127 = vmatpush3.xpose.msra.mxu0 %v354_v10  ;;  %1247 = vmatpush3.xpose.msra.mxu1 %v354_v10 }
  0x5b   : > { %1128 = vmatprep.subr.mxu0 %v353_v11  ;;  %1232 = vmatprep.subr.mxu1 %v353_v11 }
  0x5e   : > { %1129 = vmatpush3.xpose.msra.mxu0 %v353_v11  ;;  %1248 = vmatpush3.xpose.msra.mxu1 %v353_v11 }
  0x5f   : > { %1130 = vmatprep.subr.mxu0 %v352_v12  ;;  %1233 = vmatprep.subr.mxu1 %v352_v12 }
  0x62   : > { %1131 = vmatpush3.xpose.msra.mxu0 %v352_v12  ;;  %1249 = vmatpush3.xpose.msra.mxu1 %v352_v12 }
  0x63   : > { %1132 = vmatprep.subr.mxu0 %v351_v13  ;;  %1234 = vmatprep.subr.mxu1 %v351_v13 }
  0x66   : > { %1133 = vmatpush3.xpose.msra.mxu0 %v351_v13  ;;  %1250 = vmatpush3.xpose.msra.mxu1 %v351_v13 }
  0x67   : > { %1134 = vmatprep.subr.mxu0 %v350_v14  ;;  %1235 = vmatprep.subr.mxu1 %v350_v14 }
  0x6a   : > { %1135 = vmatpush3.xpose.msra.mxu0 %v350_v14  ;;  %1251 = vmatpush3.xpose.msra.mxu1 %v350_v14 }
  0x6b   : > { %1136 = vmatprep.subr.mxu0 %v349_v15  ;;  %1236 = vmatprep.subr.mxu1 %v349_v15 }
  0x6e   : > { %1137 = vmatpush3.xpose.msra.mxu0 %v349_v15  ;;  %1252 = vmatpush3.xpose.msra.mxu1 %v349_v15 }
  0x6f   : > { %1138 = vmatprep.subr.mxu0 %v348_v16  ;;  %1237 = vmatprep.subr.mxu1 %v348_v16 }
  0x72   : > { %1139 = vmatpush3.xpose.msra.mxu0 %v348_v16  ;;  %1253 = vmatpush3.xpose.msra.mxu1 %v348_v16 }
  0x73   : > { %1140 = vmatprep.subr.mxu0 %v347_v17  ;;  %1238 = vmatprep.subr.mxu1 %v347_v17 }
  0x76   : > { %1141 = vmatpush3.xpose.msra.mxu0 %v347_v17  ;;  %1254 = vmatpush3.xpose.msra.mxu1 %v347_v17 }
  0x77   : > { %1142 = vmatprep.subr.mxu0 %v346_v18  ;;  %1239 = vmatprep.subr.mxu1 %v346_v18 }
  0x7a   : > { %1143 = vmatpush3.xpose.msra.mxu0 %v346_v18  ;;  %1255 = vmatpush3.xpose.msra.mxu1 %v346_v18 }
  0x7d   : > { %1145 = vmatmul.mubr.f32.vlgmr.msra.gmra.mxu0 %v331_v19  ;;  %1157 = vmatmul.mubr.f32.vlgmr.msra.gmra.mxu1 %v339_v20 }
  0x7e   : > { %1147 = vmatprep.mubr.f32.mxu0 %v332_v21  ;;  %1159 = vmatprep.mubr.f32.mxu1 %v340_v22 }
  0x81   : > { %1148 = vmatmul.mubr.f32.gmra.mxu0 %v333_v23  ;;  %1160 = vmatmul.mubr.f32.gmra.mxu1 %v341_v24 }
  0x82   : > { %1150 = vmatprep.mubr.f32.mxu0 %v334_v25  ;;  %1162 = vmatprep.mubr.f32.mxu1 %v342_v26 }
  0x85   : > { %1151 = vmatmul.mubr.f32.gmra.mxu0 %v335_v27  ;;  %1163 = vmatmul.mubr.f32.gmra.mxu1 %v343_v28 }
  0x86   : > { %1153 = vmatprep.mubr.f32.mxu0 %v336_v29  ;;  %1165 = vmatprep.mubr.f32.mxu1 %v344_v30 }
  0x89   : > { %1154 = vmatmul.mubr.f32.gmra.mxu0 %v337_v31  ;;  %1166 = vmatmul.mubr.f32.gmra.mxu1 %v345_v32 }
 0x13d   : > { %v1146_v34 = vpop.f32.mrf.mxu0  ;;  %v1158_v35 = vpop.f32.mrf.mxu1 }
 0x13e   : > { %v441_v36 = vadd.f32 %v1146_v34, %v1029_v33  ;;  %v481_v37 = vadd.f32 %v1158_v35, %v1029_v33 }
 0x13f   : > { %v435_v38 = vpop.f32.mrf.mxu0  ;;  %v475_v39 = vpop.f32.mrf.mxu1 }
 0x140   : > { %v515_v40 = vmax.f32 %v441_v36, 0.0  ;;  %v523_v41 = vmax.f32 %v481_v37, 0.0  ;;  %v436_v42 = vadd.f32 %v1029_v33, %v435_v38  ;;  %v476_v43 = vadd.f32 %v1029_v33, %v475_v39 }
 0x141   : > { %v1149_v44 = vpop.f32.mrf.mxu0  ;;  %v1161_v45 = vpop.f32.mrf.mxu1 }
 0x142   : > { %533 = vst [vmem:[#allocation2 + $0x8] sm:$0xff] %v515_v40  ;;  %541 = vst [vmem:[#allocation2 + $0x48] sm:$0xff] %v523_v41  ;;  %v514_v46 = vmax.f32 %v436_v42, 0.0  ;;  %v522_v47 = vmax.f32 %v476_v43, 0.0  ;;  %v451_v48 = vadd.f32 %v1149_v44, %v1029_v33  ;;  %v491_v49 = vadd.f32 %v1161_v45, %v1029_v33 }
 0x143   : > { %v445_v50 = vpop.f32.mrf.mxu0  ;;  %v485_v51 = vpop.f32.mrf.mxu1 }
 0x144   : > { %532 = vst [vmem:[#allocation2] sm:$0xff] %v514_v46  ;;  %540 = vst [vmem:[#allocation2 + $0x40] sm:$0xff] %v522_v47  ;;  %v517_v52 = vmax.f32 %v451_v48, 0.0  ;;  %v525_v53 = vmax.f32 %v491_v49, 0.0  ;;  %v446_v54 = vadd.f32 %v1029_v33, %v445_v50  ;;  %v486_v55 = vadd.f32 %v1029_v33, %v485_v51 }
 0x145   : > { %v1152_v56 = vpop.f32.mrf.mxu0  ;;  %v1164_v57 = vpop.f32.mrf.mxu1 }
 0x146   : > { %535 = vst [vmem:[#allocation2 + $0x18] sm:$0xff] %v517_v52  ;;  %543 = vst [vmem:[#allocation2 + $0x58] sm:$0xff] %v525_v53  ;;  %v516_v58 = vmax.f32 %v446_v54, 0.0  ;;  %v524_v59 = vmax.f32 %v486_v55, 0.0  ;;  %v461_v60 = vadd.f32 %v1152_v56, %v1029_v33  ;;  %v501_v61 = vadd.f32 %v1164_v57, %v1029_v33 }
 0x147   : > { %v455_v62 = vpop.f32.mrf.mxu0  ;;  %v495_v63 = vpop.f32.mrf.mxu1 }
 0x148   : > { %534 = vst [vmem:[#allocation2 + $0x10] sm:$0xff] %v516_v58  ;;  %542 = vst [vmem:[#allocation2 + $0x50] sm:$0xff] %v524_v59  ;;  %v519_v0 = vmax.f32 %v461_v60, 0.0  ;;  %v527_v1 = vmax.f32 %v501_v61, 0.0  ;;  %v456_v2 = vadd.f32 %v1029_v33, %v455_v62  ;;  %v496_v3 = vadd.f32 %v1029_v33, %v495_v63 }
 0x149   : > { %v1155_v4 = vpop.f32.mrf.mxu0  ;;  %v1167_v5 = vpop.f32.mrf.mxu1 }
 0x14a   : > { %537 = vst [vmem:[#allocation2 + $0x28] sm:$0xff] %v519_v0  ;;  %545 = vst [vmem:[#allocation2 + $0x68] sm:$0xff] %v527_v1  ;;  %v518_v6 = vmax.f32 %v456_v2, 0.0  ;;  %v526_v7 = vmax.f32 %v496_v3, 0.0  ;;  %v471_v8 = vadd.f32 %v1155_v4, %v1029_v33  ;;  %v511_v9 = vadd.f32 %v1167_v5, %v1029_v33 }
 0x14b   : > { %v465_v10 = vpop.f32.mrf.mxu0  ;;  %v505_v11 = vpop.f32.mrf.mxu1 }
 0x14c   : > { %536 = vst [vmem:[#allocation2 + $0x20] sm:$0xff] %v518_v6  ;;  %544 = vst [vmem:[#allocation2 + $0x60] sm:$0xff] %v526_v7  ;;  %v521_v12 = vmax.f32 %v471_v8, 0.0  ;;  %v529_v13 = vmax.f32 %v511_v9, 0.0  ;;  %v466_v14 = vadd.f32 %v1029_v33, %v465_v10  ;;  %v506_v15 = vadd.f32 %v1029_v33, %v505_v11 }
 0x14e   : > { %539 = vst [vmem:[#allocation2 + $0x38] sm:$0xff] %v521_v12  ;;  %547 = vst [vmem:[#allocation2 + $0x78] sm:$0xff] %v529_v13  ;;  %v520_v16 = vmax.f32 %v466_v14, 0.0  ;;  %v528_v17 = vmax.f32 %v506_v15, 0.0 }
 0x150   : > { %538 = vst [vmem:[#allocation2 + $0x30] sm:$0xff] %v520_v16  ;;  %546 = vst [vmem:[#allocation2 + $0x70] sm:$0xff] %v528_v17 }
 0x151 PF: > { %p548_p3 = scmp.lt.s32.totalorder %s1490_s15, 0  ;;  %s549_s25 = ssub.s32 0, %s1490_s15  ;;  %v579_v18 = vld [vmem:[#allocation9] sm:$0xff]  ;;  %v580_v36 = vld [vmem:[#allocation9 + $0x8] sm:$0xff]  ;;  %v581_v38 = vld [vmem:[#allocation9 + $0x10] sm:$0xff] }
 0x152   : > { %v587_v19 = vld [vmem:[#allocation9 + $0x40] sm:$0xff]  ;;  %s1030_s26 = smin.u32 %s1490_s15, %s549_s25  ;;  %1200 = vmatprep.mubr.f32.mxu0 %v579_v18  ;;  %v588_v37 = vld [vmem:[#allocation9 + $0x48] sm:$0xff]  ;;  %v589_v39 = vld [vmem:[#allocation9 + $0x50] sm:$0xff]  ;;  %p1034_p6 = scmp.ne.s32.totalorder %s1490_s15, 1 }
 0x153   : > { %1212 = vmatprep.mubr.f32.mxu1 %v587_v19  ;;  %s551_s27 = sand.u32 1, %s1030_s26   ;;  %v582_v40 = vld [vmem:[#allocation9 + $0x18] sm:$0xff]  ;;  %v583_v42 = vld [vmem:[#allocation9 + $0x20] sm:$0xff]  ;;  %v584_v44 = vld [vmem:[#allocation9 + $0x28] sm:$0xff] }
 0x154   : > { %s552_s28 = ssub.s32 0, %s551_s27  ;;  %v590_v41 = vld [vmem:[#allocation9 + $0x58] sm:$0xff]  ;;  %v591_v43 = vld [vmem:[#allocation9 + $0x60] sm:$0xff]  ;;  %v592_v45 = vld [vmem:[#allocation9 + $0x68] sm:$0xff] }
 0x155   : > { %s1699_s28 = smov (!%p548_p3, %s552_s28), %s551_s27  ;;  %v585_v46 = vld [vmem:[#allocation9 + $0x30] sm:$0xff]  ;;  %v586_v48 = vld [vmem:[#allocation9 + $0x38] sm:$0xff]  ;;  %v564_v50 = vld [vmem:[#allocation3] sm:$0xff] }
 0x156   : > { %p1032_p4 = scmp.lt.s32.totalorder %s1699_s28, 0  ;;  %s558_s29 = sadd.s32 2, %s1699_s28  ;;  %v593_v47 = vld [vmem:[#allocation9 + $0x70] sm:$0xff]  ;;  %v594_v49 = vld [vmem:[#allocation9 + $0x78] sm:$0xff]  ;;  %v572_v51 = vld [vmem:[#allocation3 + $0x20] sm:$0xff] }
 0x157   : > { %v563_v54 = vld [vmem:[#allocation3 + $0x30] sm:$0xff]  ;;  %v571_v55 = vld [vmem:[#allocation3 + $0x40] sm:$0xff]  ;;  %v566_v60 = vld [vmem:[#allocation3 + $0x18] sm:$0xff] }
 0x158   : > { %s1701_s29 = smov (!%p1032_p4, %s558_s29), %s1699_s28  ;;  %v574_v61 = vld [vmem:[#allocation3 + $0x38] sm:$0xff]  ;;  %v573_v3 = vld [vmem:[#allocation3 + $0x10] sm:$0xff]  ;;  %v568_v8 = vld [vmem:[#allocation3 + $0x68] sm:$0xff] }
 0x159   : > { %s1033_s30 = sshll.u32 %s1701_s29, 7  ;;  %v565_v2 = vld [vmem:[#allocation3 + $0x58] sm:$0xff]  ;;  %v576_v9 = vld [vmem:[#allocation3 + $0x70] sm:$0xff]  ;;  %v575_v15 = vld [vmem:[#allocation3 + $0x60] sm:$0xff] }
 0x15a   : > { %s1636_s5 = scalar_lea.vmem [#allocation2], %s1033_s30  ;;  %v567_v14 = vld [vmem:[#allocation3 + $0x50] sm:$0xff] }
 0x15b   : > { %v611_v20 = vld [vmem:[%s1636_s5 + $0x78] sm:$0xff]  ;;  %v610_v21 = vld [vmem:[%s1636_s5 + $0x70] sm:$0xff]  ;;  %v609_v22 = vld [vmem:[%s1636_s5 + $0x68] sm:$0xff] }
 0x15c   : > { %1168 = vmatprep.subr.mxu0 %v611_v20  ;;  %1256 = vmatprep.subr.mxu1 %v611_v20  ;;  %v608_v23 = vld [vmem:[%s1636_s5 + $0x60] sm:$0xff]  ;;  %v607_v24 = vld [vmem:[%s1636_s5 + $0x58] sm:$0xff]  ;;  %v606_v25 = vld [vmem:[%s1636_s5 + $0x50] sm:$0xff] }
 0x15d   : > { %1169 = vmatpush3.msra.mxu0 %v611_v20  ;;  %1272 = vmatpush3.msra.mxu1 %v611_v20  ;;  %v605_v26 = vld [vmem:[%s1636_s5 + $0x48] sm:$0xff]  ;;  %v604_v27 = vld [vmem:[%s1636_s5 + $0x40] sm:$0xff]  ;;  %v603_v28 = vld [vmem:[%s1636_s5 + $0x38] sm:$0xff] }
 0x15e   : > { %1170 = vmatprep.subr.mxu0 %v610_v21  ;;  %1257 = vmatprep.subr.mxu1 %v610_v21  ;;  %v602_v29 = vld [vmem:[%s1636_s5 + $0x30] sm:$0xff]  ;;  %v601_v30 = vld [vmem:[%s1636_s5 + $0x28] sm:$0xff]  ;;  %v600_v31 = vld [vmem:[%s1636_s5 + $0x20] sm:$0xff] }
 0x15f   : > { %1171 = vmatpush3.msra.mxu0 %v610_v21  ;;  %1273 = vmatpush3.msra.mxu1 %v610_v21  ;;  %v599_v32 = vld [vmem:[%s1636_s5 + $0x18] sm:$0xff]  ;;  %v598_v33 = vld [vmem:[%s1636_s5 + $0x10] sm:$0xff]  ;;  %v597_v34 = vld [vmem:[%s1636_s5 + $0x8] sm:$0xff] }
 0x160   : > { %1172 = vmatprep.subr.mxu0 %v609_v22  ;;  %1258 = vmatprep.subr.mxu1 %v609_v22  ;;  %v596_v35 = vld [vmem:[%s1636_s5] sm:$0xff]  ;;  %v570_v20 = vld [vmem:[#allocation3 + $0x48] sm:$0xff] }
 0x161   : > { %1173 = vmatpush3.msra.mxu0 %v609_v22  ;;  %1274 = vmatpush3.msra.mxu1 %v609_v22  ;;  %v578_v21 = vld [vmem:[#allocation3 + $0x28] sm:$0xff] }
 0x162   : > { %1174 = vmatprep.subr.mxu0 %v608_v23  ;;  %1259 = vmatprep.subr.mxu1 %v608_v23 }
 0x163   : > { %1175 = vmatpush3.msra.mxu0 %v608_v23  ;;  %1275 = vmatpush3.msra.mxu1 %v608_v23 }
 0x164   : > { %1176 = vmatprep.subr.mxu0 %v607_v24  ;;  %1260 = vmatprep.subr.mxu1 %v607_v24 }
 0x165   : > { %1177 = vmatpush3.msra.mxu0 %v607_v24  ;;  %1276 = vmatpush3.msra.mxu1 %v607_v24 }
 0x166   : > { %1178 = vmatprep.subr.mxu0 %v606_v25  ;;  %1261 = vmatprep.subr.mxu1 %v606_v25 }
 0x167   : > { %1179 = vmatpush3.msra.mxu0 %v606_v25  ;;  %1277 = vmatpush3.msra.mxu1 %v606_v25 }
 0x168   : > { %1180 = vmatprep.subr.mxu0 %v605_v26  ;;  %1262 = vmatprep.subr.mxu1 %v605_v26 }
 0x169   : > { %1181 = vmatpush3.msra.mxu0 %v605_v26  ;;  %1278 = vmatpush3.msra.mxu1 %v605_v26  ;;  %v569_v26 = vld [vmem:[#allocation3 + $0x8] sm:$0xff] }
 0x16a   : > { %1182 = vmatprep.subr.mxu0 %v604_v27  ;;  %1263 = vmatprep.subr.mxu1 %v604_v27 }
 0x16b   : > { %1183 = vmatpush3.msra.mxu0 %v604_v27  ;;  %1279 = vmatpush3.msra.mxu1 %v604_v27  ;;  %v577_v27 = vld [vmem:[#allocation3 + $0x78] sm:$0xff] }
 0x16c   : > { %1184 = vmatprep.subr.mxu0 %v603_v28  ;;  %1264 = vmatprep.subr.mxu1 %v603_v28 }
 0x16d   : > { %1185 = vmatpush3.msra.mxu0 %v603_v28  ;;  %1280 = vmatpush3.msra.mxu1 %v603_v28 }
 0x16e   : > { %1186 = vmatprep.subr.mxu0 %v602_v29  ;;  %1265 = vmatprep.subr.mxu1 %v602_v29 }
 0x16f   : > { %1187 = vmatpush3.msra.mxu0 %v602_v29  ;;  %1281 = vmatpush3.msra.mxu1 %v602_v29 }
 0x170   : > { %1188 = vmatprep.subr.mxu0 %v601_v30  ;;  %1266 = vmatprep.subr.mxu1 %v601_v30 }
 0x171   : > { %1189 = vmatpush3.msra.mxu0 %v601_v30  ;;  %1282 = vmatpush3.msra.mxu1 %v601_v30 }
 0x172   : > { %1190 = vmatprep.subr.mxu0 %v600_v31  ;;  %1267 = vmatprep.subr.mxu1 %v600_v31 }
 0x173   : > { %1191 = vmatpush3.msra.mxu0 %v600_v31  ;;  %1283 = vmatpush3.msra.mxu1 %v600_v31 }
 0x174   : > { %1192 = vmatprep.subr.mxu0 %v599_v32  ;;  %1268 = vmatprep.subr.mxu1 %v599_v32 }
 0x175   : > { %1193 = vmatpush3.msra.mxu0 %v599_v32  ;;  %1284 = vmatpush3.msra.mxu1 %v599_v32 }
 0x176   : > { %1194 = vmatprep.subr.mxu0 %v598_v33  ;;  %1269 = vmatprep.subr.mxu1 %v598_v33 }
 0x177   : > { %1195 = vmatpush3.msra.mxu0 %v598_v33  ;;  %1285 = vmatpush3.msra.mxu1 %v598_v33 }
 0x178   : > { %1196 = vmatprep.subr.mxu0 %v597_v34  ;;  %1270 = vmatprep.subr.mxu1 %v597_v34 }
 0x179   : > { %1197 = vmatpush3.msra.mxu0 %v597_v34  ;;  %1286 = vmatpush3.msra.mxu1 %v597_v34 }
 0x17a   : > { %1198 = vmatprep.subr.mxu0 %v596_v35  ;;  %1271 = vmatprep.subr.mxu1 %v596_v35 }
 0x17b   : > { %1199 = vmatpush3.msra.mxu0 %v596_v35  ;;  %1287 = vmatpush3.msra.mxu1 %v596_v35 }
 0x17c   : > { %1201 = vmatmul.mubr.f32.vlgmr.msra.gmra.mxu0 %v580_v36  ;;  %1213 = vmatmul.mubr.f32.vlgmr.msra.gmra.mxu1 %v588_v37 }
 0x17d   : > { %1203 = vmatprep.mubr.f32.mxu0 %v581_v38  ;;  %1215 = vmatprep.mubr.f32.mxu1 %v589_v39 }
 0x180   : > { %1204 = vmatmul.mubr.f32.gmra.mxu0 %v582_v40  ;;  %1216 = vmatmul.mubr.f32.gmra.mxu1 %v590_v41 }
 0x181   : > { %1206 = vmatprep.mubr.f32.mxu0 %v583_v42  ;;  %1218 = vmatprep.mubr.f32.mxu1 %v591_v43 }
 0x184   : > { %1207 = vmatmul.mubr.f32.gmra.mxu0 %v584_v44  ;;  %1219 = vmatmul.mubr.f32.gmra.mxu1 %v592_v45 }
 0x185   : > { %1209 = vmatprep.mubr.f32.mxu0 %v585_v46  ;;  %1221 = vmatprep.mubr.f32.mxu1 %v593_v47 }
 0x188   : > { %1210 = vmatmul.mubr.f32.gmra.mxu0 %v586_v48  ;;  %1222 = vmatmul.mubr.f32.gmra.mxu1 %v594_v49 }
 0x23c   : > { %v1202_v52 = vpop.f32.mrf.mxu0  ;;  %v1214_v53 = vpop.f32.mrf.mxu1 }
 0x23d   : > { %v758_v56 = vadd.f32 %v1202_v52, %v564_v50  ;;  %v766_v57 = vadd.f32 %v1214_v53, %v572_v51 }
 0x23e   : > { %v678_v58 = vpop.f32.mrf.mxu0  ;;  %v718_v59 = vpop.f32.mrf.mxu1 }
 0x23f   : > { %774 = vst [vmem:[#allocation3] sm:$0xff] %v758_v56  ;;  %782 = vst [vmem:[#allocation3 + $0x20] sm:$0xff] %v766_v57  ;;  %v757_v62 = vadd.f32 %v678_v58, %v563_v54  ;;  %v765_v63 = vadd.f32 %v718_v59, %v571_v55 }
 0x240   : > { %v1205_v0 = vpop.f32.mrf.mxu0  ;;  %v1217_v1 = vpop.f32.mrf.mxu1 }
 0x241   : > { %773 = vst [vmem:[#allocation3 + $0x30] sm:$0xff] %v757_v62  ;;  %781 = vst [vmem:[#allocation3 + $0x40] sm:$0xff] %v765_v63  ;;  %v760_v4 = vadd.f32 %v1205_v0, %v566_v60  ;;  %v768_v5 = vadd.f32 %v1217_v1, %v574_v61 }
 0x242   : > { %v688_v6 = vpop.f32.mrf.mxu0  ;;  %v728_v7 = vpop.f32.mrf.mxu1 }
 0x243   : > { %776 = vst [vmem:[#allocation3 + $0x18] sm:$0xff] %v760_v4  ;;  %784 = vst [vmem:[#allocation3 + $0x38] sm:$0xff] %v768_v5  ;;  %v759_v10 = vadd.f32 %v688_v6, %v565_v2  ;;  %v767_v11 = vadd.f32 %v728_v7, %v573_v3 }
 0x244   : > { %v1208_v12 = vpop.f32.mrf.mxu0  ;;  %v1220_v13 = vpop.f32.mrf.mxu1 }
 0x245   : > { %775 = vst [vmem:[#allocation3 + $0x58] sm:$0xff] %v759_v10  ;;  %783 = vst [vmem:[#allocation3 + $0x10] sm:$0xff] %v767_v11  ;;  %v762_v16 = vadd.f32 %v1208_v12, %v568_v8  ;;  %v770_v17 = vadd.f32 %v1220_v13, %v576_v9 }
 0x246   : > { %v698_v18 = vpop.f32.mrf.mxu0  ;;  %v738_v19 = vpop.f32.mrf.mxu1 }
 0x247   : > { %778 = vst [vmem:[#allocation3 + $0x68] sm:$0xff] %v762_v16  ;;  %786 = vst [vmem:[#allocation3 + $0x70] sm:$0xff] %v770_v17  ;;  %v761_v22 = vadd.f32 %v698_v18, %v567_v14  ;;  %v769_v23 = vadd.f32 %v738_v19, %v575_v15 }
 0x248   : > { %v1211_v24 = vpop.f32.mrf.mxu0  ;;  %v1223_v25 = vpop.f32.mrf.mxu1 }
 0x249   : > { %777 = vst [vmem:[#allocation3 + $0x50] sm:$0xff] %v761_v22  ;;  %785 = vst [vmem:[#allocation3 + $0x60] sm:$0xff] %v769_v23  ;;  %v764_v28 = vadd.f32 %v1211_v24, %v570_v20  ;;  %v772_v29 = vadd.f32 %v1223_v25, %v578_v21  ;;  %795 = sbr.rel (%p1034_p6) target bundleno = 599 (0x257), region = 64 }
 0x24a   : > { %v708_v30 = vpop.f32.mrf.mxu0  ;;  %v748_v31 = vpop.f32.mrf.mxu1 }
 0x24b   : > { %780 = vst [vmem:[#allocation3 + $0x48] sm:$0xff] %v764_v28  ;;  %788 = vst [vmem:[#allocation3 + $0x28] sm:$0xff] %v772_v29  ;;  %v763_v32 = vadd.f32 %v708_v30, %v569_v26  ;;  %v771_v33 = vadd.f32 %v748_v31, %v577_v27 }
 0x24d   : > { %779 = vst [vmem:[#allocation3 + $0x8] sm:$0xff] %v763_v32  ;;  %787 = vst [vmem:[#allocation3 + $0x78] sm:$0xff] %v771_v33 }
 0x24e   : > { %v796_v34 = vld [vmem:[#allocation3 + $0x30] sm:$0xff]  ;;  %v797_v35 = vld [vmem:[#allocation3] sm:$0xff]  ;;  %v798_v36 = vld [vmem:[#allocation3 + $0x58] sm:$0xff] }
 0x24f   : > { %812 = vst [vmem:[#allocation10] sm:$0xff] %v796_v34  ;;  %813 = vst [vmem:[#allocation10 + $0x8] sm:$0xff] %v797_v35  ;;  %v799_v37 = vld [vmem:[#allocation3 + $0x18] sm:$0xff]  ;;  %v801_v39 = vld [vmem:[#allocation3 + $0x68] sm:$0xff] }
 0x250   : > { %814 = vst [vmem:[#allocation10 + $0x10] sm:$0xff] %v798_v36  ;;  %v800_v38 = vld [vmem:[#allocation3 + $0x50] sm:$0xff]  ;;  %815 = vst [vmem:[#allocation10 + $0x18] sm:$0xff] %v799_v37  ;;  %v804_v42 = vld [vmem:[#allocation3 + $0x40] sm:$0xff] }
 0x251   : > { %816 = vst [vmem:[#allocation10 + $0x20] sm:$0xff] %v800_v38  ;;  %817 = vst [vmem:[#allocation10 + $0x28] sm:$0xff] %v801_v39  ;;  %v805_v43 = vld [vmem:[#allocation3 + $0x20] sm:$0xff]  ;;  %v806_v44 = vld [vmem:[#allocation3 + $0x10] sm:$0xff] }
 0x252   : > { %v803_v41 = vld [vmem:[#allocation3 + $0x48] sm:$0xff]  ;;  %820 = vst [vmem:[#allocation10 + $0x40] sm:$0xff] %v804_v42  ;;  %v807_v45 = vld [vmem:[#allocation3 + $0x38] sm:$0xff]  ;;  %821 = vst [vmem:[#allocation10 + $0x48] sm:$0xff] %v805_v43 }
 0x253   : > { %819 = vst [vmem:[#allocation10 + $0x38] sm:$0xff] %v803_v41  ;;  %822 = vst [vmem:[#allocation10 + $0x50] sm:$0xff] %v806_v44  ;;  %v808_v46 = vld [vmem:[#allocation3 + $0x60] sm:$0xff]  ;;  %v809_v47 = vld [vmem:[#allocation3 + $0x70] sm:$0xff] }
 0x254   : > { %v802_v40 = vld [vmem:[#allocation3 + $0x8] sm:$0xff]  ;;  %823 = vst [vmem:[#allocation10 + $0x58] sm:$0xff] %v807_v45  ;;  %v810_v48 = vld [vmem:[#allocation3 + $0x78] sm:$0xff]  ;;  %824 = vst [vmem:[#allocation10 + $0x60] sm:$0xff] %v808_v46 }
 0x255   : > { %818 = vst [vmem:[#allocation10 + $0x30] sm:$0xff] %v802_v40  ;;  %825 = vst [vmem:[#allocation10 + $0x68] sm:$0xff] %v809_v47  ;;  %v811_v49 = vld [vmem:[#allocation3 + $0x28] sm:$0xff] }
 0x256   : > { %826 = vst [vmem:[#allocation10 + $0x70] sm:$0xff] %v810_v48  ;;  %827 = vst [vmem:[#allocation10 + $0x78] sm:$0xff] %v811_v49 }
 0x257 PF: > { %p1035_p5 = scmp.ge.s32.totalorder %s1490_s15, 1 }
 0x258   : > { %s832_s6 = sadd.s32 (!%p1035_p5), 1, %s1490_s15 }
 0x259   : > { %831 = sbr.rel (%p1035_p5) target bundleno = 620 (0x26c), region = 68  ;;  %p833_p2 = scmp.lt.s32.totalorder (!%p1035_p5), %s832_s6, 0 }
 0x25a   : > { %s834_s7 = ssub.s32 (!%p1035_p5), 0, %s832_s6 }
 0x25b   : > { %s1036_s8 = smin.u32 (!%p1035_p5), %s834_s7, %s832_s6 }
 0x25c   : > { %s836_s9 = sand.u32 (!%p1035_p5), 1, %s1036_s8  }
 0x25d   : > { %s837_s10 = ssub.s32 (!%p1035_p5), 0, %s836_s9 }
 0x25e   : > { %s1703_s10 = smov (!%p833_p2, %s837_s10), %s836_s9  ;;  %v848_v50 = vld [vmem:[#allocation3 + $0x30] sm:$0xff]  ;;  %v849_v51 = vld [vmem:[#allocation3] sm:$0xff]  ;;  %v850_v52 = vld [vmem:[#allocation3 + $0x58] sm:$0xff] }
 0x25f   : > { %p1038_p9 = scmp.lt.s32.totalorder %s1703_s10, 0  ;;  %s843_s11 = sadd.s32 2, %s1703_s10  ;;  %v851_v53 = vld [vmem:[#allocation3 + $0x18] sm:$0xff]  ;;  %v852_v54 = vld [vmem:[#allocation3 + $0x50] sm:$0xff]  ;;  %v853_v55 = vld [vmem:[#allocation3 + $0x68] sm:$0xff] }
 0x260   : > { %v854_v56 = vld [vmem:[#allocation3 + $0x8] sm:$0xff]  ;;  %v856_v58 = vld [vmem:[#allocation3 + $0x40] sm:$0xff]  ;;  %v858_v60 = vld [vmem:[#allocation3 + $0x10] sm:$0xff] }
 0x261   : > { %v855_v57 = vld [vmem:[#allocation3 + $0x48] sm:$0xff]  ;;  %v857_v59 = vld [vmem:[#allocation3 + $0x20] sm:$0xff]  ;;  %s1705_s11 = smov (!%p1038_p9, %s843_s11), %s1703_s10  ;;  %v859_v61 = vld [vmem:[#allocation3 + $0x38] sm:$0xff] }
 0x262   : > { %v860_v62 = vld [vmem:[#allocation3 + $0x60] sm:$0xff]  ;;  %v861_v63 = vld [vmem:[#allocation3 + $0x70] sm:$0xff]  ;;  %v862_v0 = vld [vmem:[#allocation3 + $0x78] sm:$0xff]  ;;  %s1039_s15 = sshll.u32 %s1705_s11, 7 }
 0x263   : > { %v863_v1 = vld [vmem:[#allocation3 + $0x28] sm:$0xff]  ;;  %s864_s12 = scalar_lea.vmem [#allocation2], %s1039_s15 }
 0x264   : > { %865 = vst [vmem:[%s864_s12] sm:$0xff] %v848_v50  ;;  %866 = vst [vmem:[%s864_s12 + $0x8] sm:$0xff] %v849_v51 }
 0x265   : > { %867 = vst [vmem:[%s864_s12 + $0x10] sm:$0xff] %v850_v52  ;;  %868 = vst [vmem:[%s864_s12 + $0x18] sm:$0xff] %v851_v53 }
 0x266   : > { %869 = vst [vmem:[%s864_s12 + $0x20] sm:$0xff] %v852_v54  ;;  %870 = vst [vmem:[%s864_s12 + $0x28] sm:$0xff] %v853_v55 }
 0x267   : > { %871 = vst [vmem:[%s864_s12 + $0x30] sm:$0xff] %v854_v56  ;;  %872 = vst [vmem:[%s864_s12 + $0x38] sm:$0xff] %v855_v57 }
 0x268   : > { %873 = vst [vmem:[%s864_s12 + $0x40] sm:$0xff] %v856_v58  ;;  %874 = vst [vmem:[%s864_s12 + $0x48] sm:$0xff] %v857_v59 }
 0x269   : > { %875 = vst [vmem:[%s864_s12 + $0x50] sm:$0xff] %v858_v60  ;;  %876 = vst [vmem:[%s864_s12 + $0x58] sm:$0xff] %v859_v61 }
 0x26a   : > { %877 = vst [vmem:[%s864_s12 + $0x60] sm:$0xff] %v860_v62  ;;  %878 = vst [vmem:[%s864_s12 + $0x68] sm:$0xff] %v861_v63 }
 0x26b   : > { %879 = vst [vmem:[%s864_s12 + $0x70] sm:$0xff] %v862_v0  ;;  %880 = vst [vmem:[%s864_s12 + $0x78] sm:$0xff] %v863_v1 }
 0x26c PF: > { %p1659_p10 = scmp.eq.s32.totalorder %s1014_s18, 1  ;;  %s1506_s14 = smov [#allocation10]  }
 0x26d   : > { %s897_s23 = sshll.u32 %s1506_s14, 4  ;;  %s898_s23 = int_to_ptr.vmem [resolvable:$true] %s897_s23 }
 0x26e   : > { %s1440_s24 = scalar_lea.vmem %s898_s23, 2048  ;;  %s1446_s21 = scalar_lea.vmem %s898_s23, 4096 }
 0x26f   : > { %p1441_p11 = scmp.ne.s32.totalorder %s898_s23, %s1440_s24  ;;  %p1447_p0 = scmp.lt.s32.totalorder %s898_s23, %s898_s23 }
 0x270   : > { %p1448_p1 = scmp.lt.s32.totalorder %s1446_s21, %s1440_s24 }
 0x271   : > { %p1442_p12 = pnand %p1441_p11, %p1659_p10 }
 0x272   : > { %p1449_p7 = por %p1448_p1, %p1447_p0 }
 0x273   : > { %p1443_p13 = pneg %p1442_p12 }
 0x275   : > { %p1450_p8 = pnand %p1449_p7, %p1443_p13 }
 0x277   : > { %1453 = shalt.err (!%p1450_p8)
}
 0x278   : > { %s1507_s22 = smov 128   ;;  %s1508_s18 = smov 8  }
 0x279   : > { %1301 = dma.vmem_to_hbm [thread:$0]  (%p1659_p10), %s898_s23, 2048, %s1687_s4, [#allocation6], %s1507_s22, %s1507_s22, %s1508_s18  }
 0x27a PF: > { %p1328_p3 = scmp.eq.s32.totalorder %s1015_s19, 1  ;;  %p1693_p4 = scmp.ge.s32.totalorder %s1498_s17, 2 }
 0x27c   : > { %p1316_p6 = pnand %p1328_p3, %p1693_p4 }
 0x27e   : > { %p1317_p5 = pneg %p1316_p6 }
 0x280   : > { %1485 = dma.done.wait (%p1317_p5), [#allocation6], 2048  }
 0x281   : > { %1487 = vsyncadd (%p1317_p5), [#allocation6], 4294965248  ;;  %s21_s17 = sadd.s32 1, %s1498_s17   ;;  %s1694_s15 = smov %s1494_s16 }
 0x282   : > { %p18_p2 = scmp.ge.s32.totalorder %s21_s17, 4   ;;  %s1695_s16 = smov %s1697_s20 }
 0x284   :  { %20 = sbr.rel (!%p18_p2) target bundleno = 6 (0x6), region = 113 }
 0x289   :  { %918 = vsyncpa [#allocation5], 1 }
 0x28a   :  { %920 = vsyncpa [#allocation5 + $0x1], 1 }
 0x28b   :  { %921 = vsyncpa [#allocation8], 1 }
 0x28c   :  { %922 = vsyncpa [#allocation6], 1 }
 0x28d   :  { %924 = vsyncpa [#allocation6 + $0x1], 1 }

</bundles_post_ra>
